<compile_context>
chip_gen: v6e
topology: v6e:2x2x1
jax: 0.10.0
libtpu: 0.0.40
codegen_flags: <defaults>
</compile_context>

<pallas_src>
import functools

import jax
import jax.numpy as jnp
from jax import lax
from jax.experimental import pallas as pl
from jax.experimental.pallas import tpu as pltpu


def _round_up(x, m):
    return (x + m - 1) // m * m


def _score_matmul_kernel(q_ref, ent_ref, out_ref):
    # q_ref:   (tb, R)  bf16   -- streamed per inner (batch) step, tiny
    # ent_ref: (tn, R)  bf16   -- resident across the inner batch sweep
    # out_ref: (tb, tn) f32/bf16
    # scores = q @ E.T : contract the LAST dim of both operands (MXU-native,
    # no transposed entity tile materialized); bf16 feed, f32 accumulation.
    out_ref[...] = lax.dot_general(
        q_ref[...],
        ent_ref[...],
        dimension_numbers=(((1,), (1,)), ((), ())),
        preferred_element_type=jnp.float32,
    ).astype(out_ref.dtype)


@functools.partial(jax.jit, static_argnames=("batch_tile", "ent_tile", "out_dtype"))
def rescal_scores_pallas(lhs, rel, ent_bf16, *, batch_tile=None, ent_tile=None,
                         out_dtype=jnp.float32):
    """scores = bmm(lhs[:,None,:], rel).squeeze(1) @ E.T with the big matmul in Pallas.

    lhs: (B, R) f32, rel: (B, R, R) f32, ent_bf16: (N, R) bf16 (cached cast).
    Returns (B, N) scores in `out_dtype` (f32 by default).
    """
    B, R = lhs.shape
    N = ent_bf16.shape[0]
    ent_bf16 = ent_bf16.astype(jnp.bfloat16)  # no-op if the cached cast is used

    # q is tiny (B*R*R FLOPs) -> plain XLA, once per call; the kernel only does
    # the HBM-bound (B,R)x(R,N) scoring matmul.
    q = jnp.einsum("br,brk->bk", lhs, rel).astype(jnp.bfloat16)

    # Tile selection: large batch tile (each entity byte reused tb times),
    # lane-dense entity/output tile (multiple of 128 -> unmasked vst on the
    # interior blocks).  cdiv grid => no padding / no post-kernel slice copy.
    tb = batch_tile if batch_tile is not None else min(512, _round_up(B, 8))
    tn = ent_tile if ent_tile is not None else min(2048, _round_up(N, 128))
    tb = _round_up(tb, 8)
    tn = _round_up(tn, 128)

    grid = (pl.cdiv(N, tn), pl.cdiv(B, tb))  # entity axis outer, batch inner

    return pl.pallas_call(
        _score_matmul_kernel,
        out_shape=jax.ShapeDtypeStruct((B, N), out_dtype),
        grid_spec=pltpu.PrefetchScalarGridSpec(
            num_scalar_prefetch=0,
            grid=grid,
            in_specs=[
                # q tile: re-fetched each inner step (tb*R*2 bytes, negligible).
                pl.BlockSpec((tb, R), lambda j, i: (i, 0)),
                # entity tile: block index constant over the inner batch axis,
                # so it stays resident -> the bf16 entity table is read from
                # HBM exactly once per forward.
                pl.BlockSpec((tn, R), lambda j, i: (j, 0)),
            ],
            out_specs=pl.BlockSpec((tb, tn), lambda j, i: (i, j)),
        ),
        compiler_params=pltpu.CompilerParams(
            # No cross-iteration state -> both axes parallel (megacore can
            # shard the many-step entity axis regardless of batch size).
            dimension_semantics=("parallel", "parallel"),
            # Defaults (tb=512, tn=2048, R=128) use ~10 MiB double-buffered;
            # 48 MiB leaves headroom for large R and stays below v7x physical.
            vmem_limit_bytes=48 * 1024 * 1024,
        ),
    )(q, ent_bf16)


def xavier_uniform(key, shape, dtype=jnp.float32):
    # PyTorch xavier_uniform_: bound = sqrt(6 / (fan_in + fan_out));
    # for a 2-D weight (num_embeddings, dim): fan_out = shape[0], fan_in = shape[1].
    fan_out, fan_in = shape[0], shape[1]
    bound = (6.0 / (fan_in + fan_out)) ** 0.5
    return jax.random.uniform(key, shape, dtype, minval=-bound, maxval=bound)


class RescalPallas:
    """JAX/Pallas re-implementation of RESCAL.forward."""

    def __init__(self, sizes, rank, key):
        self.sizes = sizes
        self.rank = rank
        k0, k1 = jax.random.split(key)
        # embeddings[0]: entities (sizes[0], rank); embeddings[1]: relations (sizes[1], rank*rank)
        self.ent_weight = xavier_uniform(k0, (sizes[0], rank))
        self.rel_weight = xavier_uniform(k1, (sizes[1], rank * rank))
        self.refresh_entity_cache()

    def refresh_entity_cache(self):
        # Hoisted out of the per-call path: one bf16 copy of the entity table
        # feeds the MXU; re-run after each optimizer step that updates
        # ent_weight.  (The f32 master copy is kept for gathers/factors.)
        self.ent_bf16 = self.ent_weight.astype(jnp.bfloat16)

    def forward(self, x, p_hr=None, p_tr=None, batch_tile=None, ent_tile=None,
                out_dtype=jnp.float32):
        # x: (B, 3) int triples (lhs, rel, rhs)
        lhs = self.ent_weight[x[:, 0]]                                    # (B, R)
        rel = self.rel_weight[x[:, 1]].reshape(-1, self.rank, self.rank)  # (B, R, R)
        rhs = self.ent_weight[x[:, 2]]                                    # (B, R)
        if p_hr is not None:
            # Auxiliary branch: two tiny bmm's, no full-entity matmul -> plain XLA.
            h = self.ent_weight[p_hr[:, 0]]
            r = self.rel_weight[p_hr[:, 1]].reshape(-1, self.rank, self.rank)
            return (jnp.einsum("br,brk->bk", lhs, rel),
                    jnp.einsum("br,brk->bk", h, r))
        if p_tr is not None:
            t = self.ent_weight[p_tr[:, 0]]
            r = self.rel_weight[p_tr[:, 1]].reshape(-1, self.rank, self.rank)
            return (jnp.einsum("br,brk->bk", rhs, rel),
                    jnp.einsum("br,brk->bk", t, r))
        scores = rescal_scores_pallas(lhs, rel, self.ent_bf16,
                                      batch_tile=batch_tile, ent_tile=ent_tile,
                                      out_dtype=out_dtype)
        return scores, [(lhs, rel, rhs)]
        # TODO(synk): KBCModel.get_ranking / get_ranking2 host-side filtered-ranking
        #             eval loops (python dict filters + tqdm) are not part of the
        #             forward path and are omitted here.


def _reference_scores(lhs, rel, ent_weight):
    q = jnp.einsum("br,brk->bk", lhs, rel)
    return q @ ent_weight.T


if __name__ == "__main__":
    key = jax.random.PRNGKey(0)
    k_model, k_q = jax.random.split(key)

    # Small, deliberately non-aligned shapes to exercise the cdiv grid and the
    # masked edge blocks on both the entity (300 % 128 != 0) and batch
    # (20 % 8 != 0) axes.
    n_entities, n_relations, rank, batch = 300, 7, 32, 20
    model = RescalPallas(sizes=(n_entities, n_relations, n_entities),
                         rank=rank, key=k_model)

    kh, kr, kt = jax.random.split(k_q, 3)
    queries = jnp.stack([
        jax.random.randint(kh, (batch,), 0, n_entities),
        jax.random.randint(kr, (batch,), 0, n_relations),
        jax.random.randint(kt, (batch,), 0, n_entities),
    ], axis=1).astype(jnp.int32)                                          # (B, 3)

    # batch_tile=8, ent_tile=128 -> grid (3, 3): multi-step on both axes,
    # entity-tile residency across the inner batch sweep, edge masking on both.
    scores, factors = model.forward(queries, batch_tile=8, ent_tile=128)
    scores = jax.block_until_ready(scores)

    # Correctness vs. a pure-f32 JAX reference (kernel matmul is bf16 with f32
    # accumulation, so tolerances are bf16-level).
    lhs, rel, rhs = factors[0]
    ref = _reference_scores(lhs, rel, model.ent_weight)
    assert scores.shape == (batch, n_entities)
    assert scores.dtype == jnp.float32
    assert jnp.allclose(scores, ref, atol=2e-3, rtol=2e-2), (
        float(jnp.max(jnp.abs(scores - ref))))

    # Also exercise the default tile selection (single large tile per axis).
    scores2, _ = model.forward(queries)
    scores2 = jax.block_until_ready(scores2)
    assert jnp.allclose(scores2, ref, atol=2e-3, rtol=2e-2)

    print("KERNEL_OK")
</pallas_src>

<mosaic_0001>
module attributes {stable_mosaic.version = 11 : i64} {
  func.func @_score_matmul_kernel(%arg0: i32, %arg1: i32, %arg2: memref<8x32xbf16, #tpu.memory_space<vmem>>, %arg3: memref<128x32xbf16, #tpu.memory_space<vmem>>, %arg4: memref<8x128xf32, #tpu.memory_space<vmem>>) attributes {dimension_semantics = [#tpu.dimension_semantics<parallel>, #tpu.dimension_semantics<parallel>], iteration_bounds = array<i64: 3, 3>, scalar_prefetch = 0 : i64, scratch_operands = 0 : i64, tpu.core_type = #tpu.core_type<tc>, window_params = [{transform_indices = @transform_0, window_bounds = array<i64: 8, 32>}, {transform_indices = @transform_1, window_bounds = array<i64: 128, 32>}, {transform_indices = @transform_2, window_bounds = array<i64: 8, 128>}]} {
    %c0 = arith.constant 0 : index
    %c0_0 = arith.constant 0 : index
    %0 = vector.load %arg2[%c0, %c0_0] : memref<8x32xbf16, #tpu.memory_space<vmem>>, vector<8x32xbf16>
    %c0_1 = arith.constant 0 : index
    %c0_2 = arith.constant 0 : index
    %1 = vector.load %arg3[%c0_1, %c0_2] : memref<128x32xbf16, #tpu.memory_space<vmem>>, vector<128x32xbf16>
    %cst = arith.constant dense<0.000000e+00> : vector<8x128xf32>
    %2 = tpu.matmul %0, %1, %cst {dimension_numbers = #tpu.dot_dimension_numbers<[1], [1], [0], [0], [0, 0, 1, 0], [], []>} : vector<8x32xbf16>, vector<128x32xbf16>, vector<8x128xf32> -> vector<8x128xf32>
    %c0_3 = arith.constant 0 : index
    %c0_4 = arith.constant 0 : index
    %3 = vector.load %arg4[%c0_3, %c0_4] : memref<8x128xf32, #tpu.memory_space<vmem>>, vector<8x128xf32>
    tpu.vector_store %arg4[%c0_3, %c0_4], %2 {strides = array<i32>} : memref<8x128xf32, #tpu.memory_space<vmem>>, vector<8x128xf32>,
    return
  }
  func.func @transform_0(%arg0: i32, %arg1: i32) -> (i32, i32) {
    %c0_i32 = arith.constant 0 : i32
    %c0_i32_0 = arith.constant 0 : i32
    return %arg1, %c0_i32 : i32, i32
  }
  func.func @transform_1(%arg0: i32, %arg1: i32) -> (i32, i32) {
    %c0_i32 = arith.constant 0 : i32
    %c0_i32_0 = arith.constant 0 : i32
    return %arg0, %c0_i32 : i32, i32
  }
  func.func @transform_2(%arg0: i32, %arg1: i32) -> (i32, i32) {
    %c0_i32 = arith.constant 0 : i32
    return %arg1, %arg0 : i32, i32
  }
}

</mosaic_0001>

<bundles_post_ra>
// kernel: rescal_scores_pallas.1
= control target key start
LH: loop header
LB: loop body
LE: loop exit
PB: predicated region body
PF: predicated region fallthrough
CT: control target
= control target key end

     0   :  { %7 = vsyncpa [#allocation3], 0  ;;  %s824_s0 = inlined_call_operand.vmem [shape: bf16[20,32], index: 0, kind: input, shape index: {}]   ;;  %s825_s1 = inlined_call_operand.vmem [shape: bf16[300,32], index: 1, kind: input, shape index: {}]   ;;  %s826_s2 = inlined_call_operand.hbm [shape: f32[20,300], index: 2, kind: output, shape index: {}]  }
   0x1   :  { %9 = vsyncpa [#allocation3 + $0x1], 0  ;;  %s667_s9 = smov 0   ;;  %s669_s10 = smov 0  }
   0x2   :  { %s671_s11 = smov 0   ;;  %s673_s12 = smov 0  }
   0x3   :  { %s675_s13 = smov 0   ;;  %s677_s14 = smov 0  }
   0x4   :  { %s679_s15 = smov 0   ;;  %s681_s16 = smov 0  }
   0x5 LB: > { %s422_s17 = sadd.s32 4294967295, %s647_s16   ;;  %s423_s18 = sadd.s32 4294967294, %s647_s16   ;;  %s647_s16 = sphi %s681_s16, %s15_s16   ;;  %s643_s15 = sphi %s679_s15, %s835_s15   ;;  %s639_s14 = sphi %s677_s14, %s834_s14   ;;  %s635_s13 = sphi %s675_s13, %s833_s13   ;;  %s631_s12 = sphi %s673_s12, %s832_s12   ;;  %s627_s11 = sphi %s671_s11, %s831_s11   ;;  %s623_s10 = sphi %s669_s10, %s830_s10   ;;  %s619_s9 = sphi %s667_s9, %s829_s9  }
   0x6   : > { %s24_s19 = sadd.s32 1, %s639_s14  ;;  %s27_s20 = sadd.s32 1, %s643_s15 }
   0x7   : > { %p25_p0 = scmp.ge.s32.totalorder %s24_s19, 3  ;;  %p98_p1 = scmp.ne.s32.totalorder %s627_s11, %s623_s10 }
   0x8   : > { %p99_p2 = scmp.eq.s32.totalorder %s422_s17, 8  ;;  %p104_p5 = scmp.ne.s32.totalorder %s623_s10, %s619_s9 }
   0x9   : > { %s837_s19 = smov (%p25_p0, %s24_s19), 0  ;;  %s839_s20 = smov (!%p25_p0, %s27_s20), %s643_s15 }
   0xa   : > { %s83_s21 = ssub.s32 %s639_s14, %s837_s19  ;;  %p718_p3 = por %p99_p2, %p98_p1 }
   0xb   : > { %p29_p4 = scmp.ge.s32.totalorder %s839_s20, 3  ;;  %p105_p6 = scmp.eq.s32.totalorder %s423_s18, 8 }
   0xc   : > { %p426_p7 = scmp.ge.s32.totalorder %s647_s16, 1  ;;  %p147_p9 = scmp.lt.s32.totalorder %s647_s16, 10 }
   0xd   : > { %s841_s20 = smov (%p29_p4, %s839_s20), 0  ;;  %p727_p8 = por %p105_p6, %p104_p5 }
   0xe   : > { %s84_s24 = ssub.s32 %s643_s15, %s841_s20  ;;  %s88_s25 = sadd.s32 1, %s627_s11 }
   0xf   : > { %s85_s26 = sor.u32 %s84_s24, %s83_s21  ;;  %p148_p10 = pnand %p426_p7, %p147_p9 }
  0x10   : > { %p86_p11 = scmp.eq.s32.totalorder %s85_s26, 0  ;;  %s429_s28 = sshll.u32 (!%p148_p10), %s635_s13, 4 }
  0x11   : > { %151 = sbr.rel (%p148_p10) target bundleno = 299 (0x12b), region = 28  ;;  %p186_p12 = scmp.lt.s32.totalorder (!%p148_p10), %s429_s28, 37 }
  0x12   : > { %s736_s27 = scalar_select %p86_p11, %s627_s11, %s88_s25  }
  0x13   : > { %p177_p13 = scmp.lt.s32.totalorder (!%p148_p10), %s631_s12, 2  ;;  %s174_s18 = sand.u32 (!%p148_p10), 1, %s623_s10  }
  0x14   : > { %s473_s21 = smul.u32 (!%p148_p10), 3, %s631_s12  ;;  %s427_s24 = sshll.u32 (!%p148_p10), %s174_s18, 3 }
  0x15   : > { %s176_s26 = scalar_lea.vmem (!%p148_p10), [#allocation2], %s427_s24 }
  0x16   : > { %v649_v0 = vmov 0.0   ;;  %vm650_vm0 = vmmov 0   ;;  %s843_s28 = smov (!%p186_p12, %s429_s28), 37  ;;  %vm253_vm1 = vcmask 261120   ;;  %s334_s25 = sadd.s32 %s635_s13, %s473_s21 }
  0x17   : > { %453 = vmatprep.subr.bf16.mxu0 %v649_v0  ;;  %469 = vmatprep.mubr.msk.bf16.mxu0 %vm650_vm0, %v649_v0  ;;  %s430_s29 = sshll.u32 %s843_s28, 2  ;;  %s338_s28 = sshll.u32 %s176_s26, 4  ;;  %s769_s28 = int_to_ptr.vmem [resolvable:$true] %s338_s28 }
  0x18   : > { %s742_s4 = scalar_lea.vmem %s825_s1, %s430_s29  ;;  %s441_s29 = sshll.u32 %s334_s25, 7 }
  0x19   : > { %v547_v1 = vld [vmem:[%s742_s4 + $0x38] sm:$0xff]   ;;  %v548_v3 = vld [vmem:[%s742_s4 + $0x30] sm:$0xff]   ;;  %v549_v5 = vld [vmem:[%s742_s4 + $0x28] sm:$0xff]   ;;  %s178_s5 = scalar_select %p177_p13, %s631_s12, 2 }
  0x1a   : > { %v279_v2 = vsel %vm253_vm1, %v547_v1, 0  ;;  %v276_v4 = vsel %vm253_vm1, %v548_v3, 0  ;;  %v273_v6 = vsel %vm253_vm1, %v549_v5, 0  ;;  %v550_v7 = vld [vmem:[%s742_s4 + $0x20] sm:$0xff]   ;;  %v551_v9 = vld [vmem:[%s742_s4 + $0x18] sm:$0xff]   ;;  %v552_v11 = vld [vmem:[%s742_s4 + $0x10] sm:$0xff]  }
  0x1b   : > { %454 = vmatpush3.bf16.xpose.msra.mxu0 %v279_v2  ;;  %v270_v8 = vsel %vm253_vm1, %v550_v7, 0  ;;  %v267_v10 = vsel %vm253_vm1, %v551_v9, 0  ;;  %v264_v12 = vsel %vm253_vm1, %v552_v11, 0  ;;  %v553_v13 = vld [vmem:[%s742_s4 + $0x8] sm:$0xff]   ;;  %v554_v15 = vld [vmem:[%s742_s4] sm:$0xff]   ;;  %s428_s6 = sshll.u32 %s178_s5, 2  ;;  %s774_s4 = scalar_lea.hbm %s826_s2, %s441_s29 }
  0x1c   : > { %455 = vmatprep.subr.bf16.mxu0 %v649_v0  ;;  %v261_v14 = vsel %vm253_vm1, %v553_v13, 0  ;;  %v258_v16 = vsel %vm253_vm1, %v554_v15, 0  ;;  %s180_s17 = scalar_lea.vmem %s824_s0, %s428_s6  ;;  %s323_s5 = scalar_lea.sflag [#allocation3], %s174_s18 }
  0x1d   : > { %v196_v17 = vld [vmem:[%s180_s17] sm:$0xf]  ;;  %s555_s12 = scalar_lea.vmem %s769_s28, 128  ;;  %s651_s13 = smov [#allocation2]  }
  0x1e   : > { %p556_p0 = scmp.ne.s32.totalorder %s769_s28, %s555_s12  ;;  %s559_s6 = sshll.u32 %s651_s13, 4  ;;  %s560_s6 = int_to_ptr.vmem [resolvable:$false] %s559_s6 }
  0x1f   : > { %s561_s7 = scalar_lea.vmem %s560_s6, 256  ;;  %p562_p4 = scmp.lt.s32.totalorder %s769_s28, %s560_s6 }
  0x20   : > { %p557_p1 = pnand %p556_p0, %p718_p3  ;;  %p563_p5 = scmp.lt.s32.totalorder %s561_s7, %s555_s12 }
  0x22   : > { %p558_p2 = pneg %p557_p1  ;;  %p564_p6 = por %p563_p5, %p562_p4 }
  0x23   : > { %456 = vmatpush3.bf16.xpose.msra.mxu0 %v276_v4 }
  0x24   : > { %457 = vmatprep.subr.bf16.mxu0 %v649_v0  ;;  %p565_p7 = pnand %p564_p6, %p558_p2 }
  0x2b   : > { %458 = vmatpush3.bf16.xpose.msra.mxu0 %v273_v6 }
  0x2c   : > { %459 = vmatprep.subr.bf16.mxu0 %v649_v0 }
  0x33   : > { %460 = vmatpush3.bf16.xpose.msra.mxu0 %v270_v8 }
  0x34   : > { %461 = vmatprep.subr.bf16.mxu0 %v649_v0 }
  0x3b   : > { %462 = vmatpush3.bf16.xpose.msra.mxu0 %v267_v10 }
  0x3c   : > { %463 = vmatprep.subr.bf16.mxu0 %v649_v0 }
  0x43   : > { %464 = vmatpush3.bf16.xpose.msra.mxu0 %v264_v12 }
  0x44   : > { %465 = vmatprep.subr.bf16.mxu0 %v649_v0 }
  0x4b   : > { %466 = vmatpush3.bf16.xpose.msra.mxu0 %v261_v14 }
  0x4c   : > { %467 = vmatprep.subr.bf16.mxu0 %v649_v0 }
  0x53   : > { %468 = vmatpush3.bf16.xpose.msra.mxu0 %v258_v16 }
  0x5a   : > { %470 = vmatmul.mubr.msk.bf16.vlgmr.msra.gmra.mxu0 %vm253_vm1, %v196_v17 }
 0x11a   : > { %v315_v18 = vpop.f32.mrf.mxu0 }
 0x11b   : > { %321 = vst [vmem:[%s176_s26] sm:$0xff] %v315_v18 }
 0x11c   : > { %v471_v19 = vpop.f32.mrf.mxu0 }
 0x11d   : > { %568 = shalt.err (!%p565_p7)
}
 0x11e   : > { %s569_s8 = scalar_lea.hbm %s774_s4, 128  ;;  %s573_s21 = scalar_lea.hbm %s826_s2, 1152 }
 0x11f   : > { %p570_p9 = scmp.ne.s32.totalorder %s774_s4, %s569_s8  ;;  %p574_p12 = scmp.lt.s32.totalorder %s774_s4, %s826_s2 }
 0x120   : > { %p575_p13 = scmp.lt.s32.totalorder %s573_s21, %s569_s8 }
 0x121   : > { %p571_p10 = pnand %p570_p9, %p718_p3 }
 0x122   : > { %p576_p0 = por %p575_p13, %p574_p12 }
 0x123   : > { %p572_p11 = pneg %p571_p10 }
 0x125   : > { %p577_p1 = pnand %p576_p0, %p572_p11 }
 0x127   : > { %580 = shalt.err (!%p577_p1)
}
 0x128   : > { %474 = dma.vmem_to_hbm [thread:$0]  (%p718_p3), %s769_s28, 128, %s774_s4, %s323_s5   ;;  %v318_v20 = vpop.f32.mrf.mxu0 }
 0x12a   : > { %v472_v21 = vpop.f32.mrf.mxu0 }
 0x12b PF: > { %p480_p2 = scmp.ge.s32.totalorder %s647_s16, 2  ;;  %s350_s26 = sand.u32 1, %s619_s9  }
 0x12c   : > { %s351_s29 = scalar_lea.sflag [#allocation3], %s350_s26 }
 0x12d   : > { %p477_p4 = pnand %p480_p2, %p727_p8 }
 0x12f   : > { %p478_p5 = pneg %p477_p4 }
 0x131   : > { %614 = dma.done.wait (%p478_p5), %s351_s29, 128  }
 0x132   : > { %616 = vsyncadd (%p478_p5), %s351_s29, 4294967168  ;;  %s15_s16 = sadd.s32 1, %s647_s16   ;;  %s829_s9 = smov %s623_s10 }
 0x133   : > { %p12_p6 = scmp.ge.s32.totalorder %s15_s16, 11   ;;  %s830_s10 = smov %s627_s11 }
 0x134   : > { %s831_s11 = smov %s736_s27  ;;  %s832_s12 = smov %s639_s14 }
 0x135   : > { %s833_s13 = smov %s643_s15  ;;  %s834_s14 = smov %s837_s19 }
 0x136   : > { %s835_s15 = smov %s841_s20  ;;  %14 = sbr.rel (!%p12_p6) target bundleno = 5 (0x5), region = 66 }
 0x13b   :  { %356 = vsyncpa [#allocation3], 1 }
 0x13c   :  { %358 = vsyncpa [#allocation3 + $0x1], 1 }

</bundles_post_ra>
